<compile_context>
chip_gen: v5e
topology: v5e:2x2
jax: 0.10.0
libtpu: 0.0.40
codegen_flags: <defaults>
</compile_context>

<pallas_src>
import math
import itertools
from functools import partial

import jax
import jax.numpy as jnp
from jax import lax
from jax.experimental import pallas as pl
from jax.experimental.pallas import tpu as pltpu


def _round_up(x: int, m: int) -> int:
    return ((x + m - 1) // m) * m


# VMEM working-set budget for tile selection (leaves headroom under the 32 MiB scoped
# limit we request below, which itself is safe on v5e/v6e/v7x).
_VMEM_BUDGET = 20 * 1024 * 1024
_VMEM_LIMIT = 32 * 1024 * 1024


# ---------------------------------------------------------------------------------------
# Pallas kernels:  Y[b] = W (Np, K) @ Xc[b] (K, M)  [+ bias]
#   w_ref: (Np, TK) bf16   x_ref: (TK, TM) bf16   b_ref: (Np, 1) f32   o_ref: (Np, TM) f32
# ---------------------------------------------------------------------------------------
def _mm_kernel_bias(w_ref, x_ref, b_ref, o_ref):
    # Single K tile (weight fully resident): direct write, no accumulator scratch.
    o_ref[...] = (
        jnp.dot(w_ref[...], x_ref[...], preferred_element_type=jnp.float32) + b_ref[...]
    ).astype(o_ref.dtype)


def _mm_kernel_nobias(w_ref, x_ref, o_ref):
    o_ref[...] = jnp.dot(
        w_ref[...], x_ref[...], preferred_element_type=jnp.float32
    ).astype(o_ref.dtype)


def _mm_kernel_bias_acc(w_ref, x_ref, b_ref, o_ref, acc_ref):
    @pl.when(pl.program_id(2) == 0)
    def _():
        acc_ref[...] = jnp.zeros_like(acc_ref)

    acc_ref[...] += jnp.dot(w_ref[...], x_ref[...], preferred_element_type=jnp.float32)

    @pl.when(pl.program_id(2) == pl.num_programs(2) - 1)
    def _():
        o_ref[...] = (acc_ref[...] + b_ref[...]).astype(o_ref.dtype)


def _mm_kernel_nobias_acc(w_ref, x_ref, o_ref, acc_ref):
    @pl.when(pl.program_id(2) == 0)
    def _():
        acc_ref[...] = jnp.zeros_like(acc_ref)

    acc_ref[...] += jnp.dot(w_ref[...], x_ref[...], preferred_element_type=jnp.float32)

    @pl.when(pl.program_id(2) == pl.num_programs(2) - 1)
    def _():
        o_ref[...] = acc_ref[...].astype(o_ref.dtype)


# ---------------------------------------------------------------------------------------
# Tile selection
# ---------------------------------------------------------------------------------------
def _choose_tiles(batch, np_, k, m, op_bytes):
    """Returns (tm, mp, tk, kp, k_tiles).  `k` is already sublane-aligned."""
    # M tile (lane dim): pick the candidate minimizing padding waste, ties -> larger tile.
    m128 = _round_up(m, 128)
    cands = [c for c in (512, 384, 256, 128) if c <= m128]
    tm = min(cands, key=lambda c: (_round_up(m, c), -c))
    # v7x megacore: make sure there are >= 2 "parallel" tiles so neither TensorCore idles.
    if batch * (_round_up(m, tm) // tm) < 2 and m128 > 128:
        tm = max(128, _round_up(m128 // 2, 128))
    mp = _round_up(m, tm)

    def footprint(tk, k_tiles):
        return (2 * tk * tm * op_bytes          # x tile (double-buffered)
                + 2 * np_ * tk * op_bytes       # w tile (double-buffered / resident)
                + 2 * np_ * tm * 4              # out tile (f32, double-buffered)
                + (np_ * tm * 4 if k_tiles > 1 else 0)   # f32 accumulator scratch
                + 2 * np_ * 4)                  # bias

    if footprint(k, 1) <= _VMEM_BUDGET:
        return tm, mp, k, k, 1                  # whole weight resident, K axis collapsed
    tk = 2048
    while tk > 128 and footprint(tk, 2) > _VMEM_BUDGET:
        tk //= 2
    kp = _round_up(k, tk)
    return tm, mp, tk, kp, kp // tk


# ---------------------------------------------------------------------------------------
# Batched transposed GEMM driver
# ---------------------------------------------------------------------------------------
def _pallas_conv_matmul(w_pad, xc, bias_pad):
    """w_pad: (Np, K) ; xc: (B, K, M) (same dtype as w_pad) ; bias_pad: (Np, 1) f32 or None.
    Returns (B, Np, Mp) f32; only [:, :, :M] is meaningful."""
    np_, k = w_pad.shape
    batch, k2, m = xc.shape
    assert k == k2
    op_bytes = jnp.dtype(w_pad.dtype).itemsize

    tm, mp, tk, kp, k_tiles = _choose_tiles(batch, np_, k, m, op_bytes)

    if kp != k:
        w_pad = jnp.pad(w_pad, ((0, 0), (0, kp - k)))
    if kp != k or mp != m:
        xc = jnp.pad(xc, ((0, 0), (0, kp - k), (0, mp - m)))

    m_tiles = mp // tm
    has_bias = bias_pad is not None

    flops = 2 * batch * np_ * mp * kp
    bytes_accessed = (batch * kp * mp * op_bytes + np_ * kp * op_bytes
                      + batch * np_ * mp * 4 + (np_ * 4 if has_bias else 0))

    if k_tiles == 1:
        grid = (batch, m_tiles)
        in_specs = [
            pl.BlockSpec((np_, kp), lambda b, i: (0, 0)),          # weight: resident
            pl.BlockSpec((None, kp, tm), lambda b, i: (b, 0, i)),  # activations: streamed
        ]
        if has_bias:
            in_specs.append(pl.BlockSpec((np_, 1), lambda b, i: (0, 0)))
        out_spec = pl.BlockSpec((None, np_, tm), lambda b, i: (b, 0, i))
        kernel = _mm_kernel_bias if has_bias else _mm_kernel_nobias
        scratch = []
        dim_sem = ("parallel", "parallel")
    else:
        grid = (batch, m_tiles, k_tiles)
        in_specs = [
            pl.BlockSpec((np_, tk), lambda b, i, kk: (0, kk)),
            pl.BlockSpec((None, tk, tm), lambda b, i, kk: (b, kk, i)),
        ]
        if has_bias:
            in_specs.append(pl.BlockSpec((np_, 1), lambda b, i, kk: (0, 0)))
        out_spec = pl.BlockSpec((None, np_, tm), lambda b, i, kk: (b, 0, i))
        kernel = _mm_kernel_bias_acc if has_bias else _mm_kernel_nobias_acc
        scratch = [pltpu.VMEM((np_, tm), jnp.float32)]
        dim_sem = ("parallel", "parallel", "arbitrary")

    args = (w_pad, xc) + ((bias_pad,) if has_bias else ())
    return pl.pallas_call(
        kernel,
        out_shape=jax.ShapeDtypeStruct((batch, np_, mp), jnp.float32),
        grid_spec=pltpu.PrefetchScalarGridSpec(
            num_scalar_prefetch=0,
            grid=grid,
            in_specs=in_specs,
            out_specs=out_spec,
            scratch_shapes=scratch,
        ),
        compiler_params=pltpu.CompilerParams(
            dimension_semantics=dim_sem,
            vmem_limit_bytes=_VMEM_LIMIT,
        ),
        cost_estimate=pl.CostEstimate(
            flops=flops, transcendentals=0, bytes_accessed=bytes_accessed),
    )(*args)


# ---------------------------------------------------------------------------------------
# Conv forward: zero-pad -> tap-stack (no transposes) -> Pallas GEMM -> NCHW reshape
# ---------------------------------------------------------------------------------------
@partial(jax.jit, static_argnames=("out_channels", "kernel_size", "stride", "padding",
                                   "dilation"))
def conv_nd_forward(x, w_pad, bias_pad, *, out_channels, kernel_size, stride, padding,
                    dilation):
    """x: (B, C_in, *spatial) NCHW-style; w_pad: (Np, K16); bias_pad: (Np, 1) f32 or None."""
    nd = len(kernel_size)
    batch, cin = x.shape[0], x.shape[1]

    # Manual symmetric zero padding (matches torch.nn.functional.pad in LinearConvNd).
    if any(p > 0 for p in padding):
        x = jnp.pad(x, ((0, 0), (0, 0)) + tuple((p, p) for p in padding))

    # Cast to the MXU operand dtype (bf16 by default) BEFORE tap-stacking, so the one
    # materialized intermediate tensor is half-size.
    x = x.astype(w_pad.dtype)

    spatial = x.shape[2:]
    out_spatial = tuple(
        (spatial[d] - (kernel_size[d] - 1) * dilation[d] - 1) // stride[d] + 1
        for d in range(nd))
    m = int(math.prod(out_spatial))
    p_taps = int(math.prod(kernel_size))

    cols = []
    for offs in itertools.product(*[range(ks) for ks in kernel_size]):
        starts = (0, 0) + tuple(offs[d] * dilation[d] for d in range(nd))
        limits = (batch, cin) + tuple(
            starts[2 + d] + (out_spatial[d] - 1) * stride[d] + 1 for d in range(nd))
        strides = (1, 1) + tuple(stride)
        cols.append(lax.slice(x, starts, limits, strides))        # (B, C, *out_spatial)
    # (B, C, P, *out) -> (B, C*P, M): row order (c_in, k1, k2, ...) matches the flattened
    # OIHW weight; no transpose here and no transpose on the output either.
    xc = jnp.stack(cols, axis=2).reshape(batch, cin * p_taps, m)

    k = cin * p_taps
    k16 = w_pad.shape[1]
    if k16 != k:
        xc = jnp.pad(xc, ((0, 0), (0, k16 - k), (0, 0)))

    y = _pallas_conv_matmul(w_pad, xc, bias_pad)                  # (B, Np, Mp) f32
    y = y[:, :out_channels, :m].reshape((batch, out_channels) + out_spatial)
    return y


# ---------------------------------------------------------------------------------------
# Module mirror of tensorkit LinearConvNd (2-D default)
# ---------------------------------------------------------------------------------------
def _to_tuple(v, nd):
    if isinstance(v, (tuple, list)):
        assert len(v) == nd
        return tuple(int(e) for e in v)
    return (int(v),) * nd


class LinearConvNdPallas:
    """Mirror of tensorkit LinearConvNd forward: weight (C_out, C_in, *K) kaiming-uniform,
    bias zeros, zero-pad -> conv(weight, bias).  Conv is tap-stacked im2col + a per-batch
    transposed Pallas MXU GEMM (bf16 operands, f32 accumulation)."""
    # TODO(synk): weight_norm (Normed*WeightStore), data-dependent init, and the
    #             with_layer_args default-kwargs machinery are not translated.

    def __init__(self, in_channels, out_channels, kernel_size, stride=1, padding=0,
                 dilation=1, use_bias=True, spatial_ndims=2, key=None,
                 mxu_dtype=jnp.bfloat16):
        nd = spatial_ndims
        self.in_channels = int(in_channels)
        self.out_channels = int(out_channels)
        self.kernel_size = _to_tuple(kernel_size, nd)
        self.stride = _to_tuple(stride, nd)
        self.padding = _to_tuple(padding, nd)
        self.dilation = _to_tuple(dilation, nd)
        self.use_bias = bool(use_bias)

        key = key if key is not None else jax.random.PRNGKey(0)
        fan_in = in_channels * int(math.prod(self.kernel_size))
        bound = math.sqrt(6.0 / fan_in)  # kaiming-uniform style
        self.weight = jax.random.uniform(
            key, (out_channels, in_channels) + self.kernel_size,
            dtype=jnp.float32, minval=-bound, maxval=bound)
        self.bias = jnp.zeros((out_channels,), jnp.float32) if use_bias else None

        # Pre-flattened / pre-padded / pre-cast weight (computed ONCE):
        #   (C_out, C_in*prod(K)) with C_out padded to 16 sublanes and K padded to 16,
        #   stored in the MXU operand dtype (bf16).  Bias padded to the same Np, f32.
        k = in_channels * int(math.prod(self.kernel_size))
        np_ = _round_up(out_channels, 16)
        k16 = _round_up(k, 16)
        w_mat = self.weight.reshape(out_channels, k)
        self._w_pad = jnp.pad(
            w_mat, ((0, np_ - out_channels), (0, k16 - k))).astype(mxu_dtype)
        if use_bias:
            self._bias_pad = jnp.pad(self.bias, (0, np_ - out_channels)).reshape(np_, 1)
        else:
            self._bias_pad = None

    def __call__(self, x):
        return conv_nd_forward(
            x, self._w_pad, self._bias_pad,
            out_channels=self.out_channels,
            kernel_size=self.kernel_size, stride=self.stride,
            padding=self.padding, dilation=self.dilation)


if __name__ == "__main__":
    key = jax.random.PRNGKey(0)
    kx, kw = jax.random.split(key)

    batch, in_channels, hh, ww = 2, 4, 16, 16
    out_channels = 8

    x = jax.random.normal(kx, (batch, in_channels, hh, ww), dtype=jnp.float32)
    layer = LinearConvNdPallas(
        in_channels, out_channels, kernel_size=(3, 3), stride=1, padding=1,
        dilation=1, use_bias=True, spatial_ndims=2, key=kw)

    y = layer(x)
    y = jax.block_until_ready(y)

    # Reference: plain f32 XLA convolution with identical semantics.  The Pallas path
    # uses bf16 MXU operands with f32 accumulation, hence the loosened tolerance.
    y_ref = lax.conv_general_dilated(
        x, layer.weight,
        window_strides=layer.stride,
        padding=tuple((p, p) for p in layer.padding),
        rhs_dilation=layer.dilation,
        dimension_numbers=("NCHW", "OIHW", "NCHW"))
    y_ref = y_ref + layer.bias.reshape(1, -1, 1, 1)

    assert y.shape == (batch, out_channels, hh, ww), y.shape
    max_err = float(jnp.max(jnp.abs(y - y_ref)))
    assert jnp.allclose(y, y_ref, atol=5e-2, rtol=5e-2), max_err

    print("KERNEL_OK")
</pallas_src>

<mosaic_0001>
module attributes {stable_mosaic.version = 11 : i64} {
  func.func @_mm_kernel_bias(%arg0: i32, %arg1: i32, %arg2: memref<16x48xbf16, #tpu.memory_space<vmem>>, %arg3: memref<1x48x256xbf16, #tpu.memory_space<vmem>>, %arg4: memref<16x1xf32, #tpu.memory_space<vmem>>, %arg5: memref<1x16x256xf32, #tpu.memory_space<vmem>>) attributes {dimension_semantics = [#tpu.dimension_semantics<parallel>, #tpu.dimension_semantics<parallel>], iteration_bounds = array<i64: 2, 1>, scalar_prefetch = 0 : i64, scratch_operands = 0 : i64, tpu.core_type = #tpu.core_type<tc>, window_params = [{pipeline_mode = #tpu.pipeline_mode<synchronous>, transform_indices = @transform_0, window_bounds = array<i64: 16, 48>}, {transform_indices = @transform_1, window_bounds = array<i64: 1, 48, 256>}, {pipeline_mode = #tpu.pipeline_mode<synchronous>, transform_indices = @transform_2, window_bounds = array<i64: 16, 1>}, {transform_indices = @transform_3, window_bounds = array<i64: 1, 16, 256>}]} {
    %c0 = arith.constant 0 : index
    %c0_0 = arith.constant 0 : index
    %0 = vector.load %arg2[%c0, %c0_0] : memref<16x48xbf16, #tpu.memory_space<vmem>>, vector<16x48xbf16>
    %c0_1 = arith.constant 0 : index
    %c0_2 = arith.constant 0 : index
    %c0_3 = arith.constant 0 : index
    %1 = vector.load %arg3[%c0_1, %c0_2, %c0_3] : memref<1x48x256xbf16, #tpu.memory_space<vmem>>, vector<1x48x256xbf16>
    %2 = vector.shape_cast %1 : vector<1x48x256xbf16> to vector<48x256xbf16>
    %cst = arith.constant dense<0.000000e+00> : vector<16x256xf32>
    %3 = tpu.matmul %0, %2, %cst {dimension_numbers = #tpu.dot_dimension_numbers<[1], [0], [0], [1], [0, 0, 1, 1], [], []>} : vector<16x48xbf16>, vector<48x256xbf16>, vector<16x256xf32> -> vector<16x256xf32>
    %c0_4 = arith.constant 0 : index
    %c0_5 = arith.constant 0 : index
    %4 = vector.load %arg4[%c0_4, %c0_5] : memref<16x1xf32, #tpu.memory_space<vmem>>, vector<16x1xf32>
    %5 = vector.broadcast %4 : vector<16x1xf32> to vector<16x256xf32>
    %6 = arith.addf %3, %5 : vector<16x256xf32>
    %c0_6 = arith.constant 0 : index
    %c0_7 = arith.constant 0 : index
    %c0_8 = arith.constant 0 : index
    %7 = vector.load %arg5[%c0_6, %c0_7, %c0_8] : memref<1x16x256xf32, #tpu.memory_space<vmem>>, vector<1x16x256xf32>
    %8 = vector.shape_cast %7 : vector<1x16x256xf32> to vector<16x256xf32>
    %9 = vector.shape_cast %6 : vector<16x256xf32> to vector<1x16x256xf32>
    tpu.vector_store %arg5[%c0_6, %c0_7, %c0_8], %9 {strides = array<i32>} : memref<1x16x256xf32, #tpu.memory_space<vmem>>, vector<1x16x256xf32>,
    return
  }
  func.func @transform_0(%arg0: i32, %arg1: i32) -> (i32, i32) {
    %c0_i32 = arith.constant 0 : i32
    %c0_i32_0 = arith.constant 0 : i32
    %c0_i32_1 = arith.constant 0 : i32
    return %c0_i32, %c0_i32_0 : i32, i32
  }
  func.func @transform_1(%arg0: i32, %arg1: i32) -> (i32, i32, i32) {
    %c0_i32 = arith.constant 0 : i32
    %c0_i32_0 = arith.constant 0 : i32
    return %arg0, %c0_i32, %arg1 : i32, i32, i32
  }
  func.func @transform_2(%arg0: i32, %arg1: i32) -> (i32, i32) {
    %c0_i32 = arith.constant 0 : i32
    %c0_i32_0 = arith.constant 0 : i32
    %c0_i32_1 = arith.constant 0 : i32
    return %c0_i32, %c0_i32_0 : i32, i32
  }
  func.func @transform_3(%arg0: i32, %arg1: i32) -> (i32, i32, i32) {
    %c0_i32 = arith.constant 0 : i32
    %c0_i32_0 = arith.constant 0 : i32
    return %arg0, %c0_i32, %arg1 : i32, i32, i32
  }
}

</mosaic_0001>

<bundles_post_ra>
// kernel: conv_nd_forward.1
= control target key start
LH: loop header
LB: loop body
LE: loop exit
PB: predicated region body
PF: predicated region fallthrough
CT: control target
= control target key end

     0   :  { %s509_s12 = smov 0   ;;  %s511_s13 = smov 0   ;;  %s555_s0 = inlined_call_operand.vmem [shape: bf16[16,48], index: 0, kind: input, shape index: {}]   ;;  %s556_s1 = inlined_call_operand.vmem [shape: bf16[2,48,256], index: 1, kind: input, shape index: {}]   ;;  %s557_s2 = inlined_call_operand.vmem [shape: f32[16,1], index: 2, kind: input, shape index: {}]   ;;  %s558_s3 = inlined_call_operand.vmem [shape: f32[2,16,256], index: 3, kind: output, shape index: {}]  }
   0x1   :  { %s513_s14 = smov 0  }
   0x2 LB: > { %s25_s15 = sadd.s32 1, %s482_s13  ;;  %p393_p0 = scmp.ge.s32.totalorder %s486_s14, 1  ;;  %s486_s14 = sphi %s513_s14, %s13_s14   ;;  %s482_s13 = sphi %s511_s13, %s560_s13   ;;  %s478_s12 = sphi %s509_s12, %s559_s12  }
   0x3   : > { %p27_p1 = scmp.ge.s32.totalorder %s25_s15, 2  ;;  %p158_p2 = scmp.lt.s32.totalorder %s486_s14, 3 }
   0x5   : > { %s562_s15 = smov (%p27_p1, %s25_s15), 0  ;;  %p159_p3 = pnand %p393_p0, %p158_p2 }
   0x6   : > { %p191_p4 = scmp.lt.s32.totalorder (!%p159_p3), %s478_s12, 1 }
   0x7   : > { %162 = sbr.rel (%p159_p3) target bundleno = 168 (0xa8), region = 32 }
   0xc   : > { %v219_v0 = vld [vmem:[%s557_s2] sm:$0xff]  ;;  %v488_v1 = vmov 0   ;;  %s564_s12 = smov (!%p191_p4, %s478_s12), 1  ;;  %v220_v2 = vld [vmem:[%s557_s2 + $0x8] sm:$0xff]  ;;  %vm266_vm0 = vcmask 392192  }
   0xd   : > { %463 = vset.pattern.permute.xlu0 %v488_v1  ;;  %s437_s18 = smul.u32 48, %s564_s12  ;;  %v430_v21 = vld [vmem:[%s555_s0] sm:$0xff]  ;;  %s429_s26 = sshll.u32 %s564_s12, 5 }
   0xe   : > { %223 = vperm.xlu0 %463, %v219_v0   ;;  %s208_s29 = scalar_lea.vmem %s558_s3, %s429_s26 }
   0xf   : > { %s198_s21 = scalar_lea.vmem %s556_s1, %s437_s18 }
  0x10   : > { %v419_v3 = vld [vmem:[%s198_s21 + $0x20] sm:$0xf]  ;;  %v436_v4 = vld [vmem:[%s198_s21 + $0x24] sm:$0xf0]  ;;  %v435_v5 = vld [vmem:[%s198_s21 + $0x24] sm:$0xf] }
  0x11   : > { %v420_v6 = vor.u32 %v436_v4, %v419_v3  ;;  %v421_v7 = vld [vmem:[%s198_s21 + $0x28] sm:$0xf0]  ;;  %v411_v8 = vld [vmem:[%s198_s21 + $0x10] sm:$0xf]  ;;  %v434_v9 = vld [vmem:[%s198_s21 + $0x14] sm:$0xf0] }
  0x12   : > { %v424_v10 = vor.u32 %v435_v5, %v421_v7  ;;  %v433_v11 = vld [vmem:[%s198_s21 + $0x14] sm:$0xf]  ;;  %v413_v12 = vld [vmem:[%s198_s21 + $0x18] sm:$0xf0]  ;;  %v412_v13 = vor.u32 %v434_v9, %v411_v8  ;;  %v403_v15 = vld [vmem:[%s198_s21] sm:$0xf] }
  0x13   : > { %275 = vmatpush.bf16.msra.mxu0 %v420_v6  ;;  %v416_v14 = vor.u32 %v433_v11, %v413_v12  ;;  %v432_v16 = vld [vmem:[%s198_s21 + $0x4] sm:$0xf0]  ;;  %v431_v17 = vld [vmem:[%s198_s21 + $0x4] sm:$0xf]  ;;  %v405_v18 = vld [vmem:[%s198_s21 + $0x8] sm:$0xf0] }
  0x14   : > { %289 = vmatpush.bf16.msra.mxu1 %v424_v10  ;;  %v404_v19 = vor.u32 %v432_v16, %v403_v15  ;;  %v408_v20 = vor.u32 %v431_v17, %v405_v18 }
  0x16   : > { %228 = vperm.xlu0 %463, %v220_v2  }
  0x17   : > { %276 = vmatpush.bf16.msra.mxu0 %v412_v13 }
  0x18   : > { %290 = vmatpush.bf16.msra.mxu1 %v416_v14 }
  0x1b   : > { %277 = vmatpush.bf16.msra.mxu0 %v404_v19 }
  0x1c   : > { %291 = vmatpush.bf16.msra.mxu1 %v408_v20 }
  0x1e   : > { %425 = vmatmul.msk.bf16.vlgmr.msra.gmra.mxu0 %vm266_vm0, %v430_v21 }
  0x1f   : > { %426 = vmatmul.msk.bf16.vlgmr.msra.gmra.mxu1 %vm266_vm0, %v430_v21 }
  0x80   : > { %v224_v22 = vpop.permute.xlu0 %223 }
  0x88   : > { %v229_v27 = vpop.permute.xlu0 %228 }
  0x9b   : > { %v279_v23 = vpop.f32.mrf.mxu0 }
  0x9c   : > { %v280_v24 = vadd.f32 %v279_v23, %v224_v22  ;;  %v293_v25 = vpop.f32.mrf.mxu1 }
  0x9d   : > { %v294_v26 = vadd.f32 %v293_v25, %v224_v22 }
  0x9e   : > { %298 = vst [vmem:[%s208_s29] sm:$0xff] %v280_v24 }
  0x9f   : > { %299 = vst [vmem:[%s208_s29 + $0x8] sm:$0xff] %v294_v26 }
  0xa3   : > { %v281_v28 = vpop.f32.mrf.mxu0 }
  0xa4   : > { %v282_v29 = vadd.f32 %v281_v28, %v229_v27  ;;  %v295_v30 = vpop.f32.mrf.mxu1 }
  0xa5   : > { %v296_v31 = vadd.f32 %v295_v30, %v229_v27 }
  0xa6   : > { %300 = vst [vmem:[%s208_s29 + $0x10] sm:$0xff] %v282_v29 }
  0xa7   : > { %301 = vst [vmem:[%s208_s29 + $0x18] sm:$0xff] %v296_v31 }
  0xa8 PF: > { %s13_s14 = sadd.s32 1, %s486_s14   ;;  %s559_s12 = smov %s482_s13 }
  0xa9   : > { %p10_p5 = scmp.ge.s32.totalorder %s13_s14, 4   ;;  %s560_s13 = smov %s562_s15 }
  0xab   :  { %12 = sbr.rel (!%p10_p5) target bundleno = 2 (0x2), region = 62 }

</bundles_post_ra>
